<compile_context>
chip_gen: v5e
topology: v5e:2x2
jax: 0.10.0
libtpu: 0.0.40
codegen_flags: <defaults>
</compile_context>

<pallas_src>
import math

import jax
import jax.numpy as jnp
from jax.experimental import pallas as pl
from jax.experimental.pallas import tpu as pltpu


# --------------------------------------------------------------------------- #
# Helpers
# --------------------------------------------------------------------------- #
def _round_up(x, m):
    return ((x + m - 1) // m) * m


def _hw_config():
    """Per-generation tiling knobs, keyed off detected VMEM capacity."""
    vmem_bytes = 64 * 1024 * 1024  # conservative default (v7x per-TC VMEM)
    try:
        vmem_bytes = int(pltpu.get_tpu_info().vmem_capacity_bytes)
    except Exception:
        pass
    if vmem_bytes <= 80 * 1024 * 1024:
        # v7x-like: 64 MiB VMEM per TensorCore, 2 TCs per chip.
        return dict(lane_tile_target=512, tm_target=512,
                    vmem_limit_bytes=48 * 1024 * 1024, two_tc=True)
    # v5e / v6e: 128 MiB VMEM, single TensorCore.
    return dict(lane_tile_target=1024, tm_target=512,
                vmem_limit_bytes=64 * 1024 * 1024, two_tc=False)


def _choose_tile_and_pad(dim, target):
    """Pick a lane tile (multiple of 128, <= target) and the padded dim.

    Prefers the largest tile whose zero-padding overhead stays <= 128 lanes,
    so e.g. dim=640 picks a 384/768 split instead of falling back to 128.
    """
    dim128 = _round_up(dim, 128)
    if dim128 <= target:
        return dim128, dim128
    t = target
    while t >= 128:
        padded = _round_up(dim128, t)
        if padded - dim128 <= 128:
            return t, padded
        t -= 128
    return 128, dim128  # unreachable (t=128 always has zero waste)


def _sublane_multiple(dtype):
    """Minimum row-tile granularity for packed sub-32-bit dtypes."""
    return max(8, 32 // jnp.dtype(dtype).itemsize)


# --------------------------------------------------------------------------- #
# Kernel
# --------------------------------------------------------------------------- #
def _lora_kernel(x_ref, wt_ref, t_ref, bt_ref, bias_ref, o_ref, acc_ref):
    """One (i, j, k) grid step of  y = x @ Wt + bias + t @ (scale*Bt).

    x_ref   : (tm, tk)       input tile                     block (i, k)
    wt_ref  : (tk, tn)       base weight (W.T) tile         block (k, j)
    t_ref   : (tm, rank_p)   precomputed x @ A.T tile       block (i, 0)
    bt_ref  : (rank_p, tn)   (scale * lora_B).T tile        block (0, j)
    bias_ref: (1, tn)        bias tile                      block (0, j)
    o_ref   : (tm, tn)       output tile                    block (i, j)
    acc_ref : (tm, tn)       f32 base-path accumulator      (scratch)
    """
    k = pl.program_id(2)

    @pl.when(k == 0)
    def _():
        acc_ref[...] = jnp.zeros_like(acc_ref)

    # Native MXU mapping: contract last dim of x with first dim of W.T.
    acc_ref[...] += jnp.dot(x_ref[...], wt_ref[...],
                            preferred_element_type=jnp.float32)

    @pl.when(k == pl.num_programs(2) - 1)
    def _():
        # LoRA up-projection only once per (i, j) tile; scale is already
        # folded into bt_ref in the one-time parameter preprocessing.
        lora = jnp.dot(t_ref[...], bt_ref[...],
                       preferred_element_type=jnp.float32)
        o_ref[...] = (acc_ref[...] + bias_ref[...] + lora).astype(o_ref.dtype)


# --------------------------------------------------------------------------- #
# One-time parameter preprocessing (do this once at load time, then reuse)
# --------------------------------------------------------------------------- #
def prepare_linear_lora_params(W, bias, lora_A, lora_B, scale=1.0, *,
                               compute_dtype=None):
    """Pre-transpose, scale-fold and zero-pad the LinearLora parameters.

    W      : (out_features, in_features)   (PyTorch nn.Linear layout)
    bias   : (out_features,) or None
    lora_A : (rank, in_features)
    lora_B : (out_features, rank)
    Returns a dict consumed by linear_lora_apply().
    """
    out_f, in_f = W.shape
    rank = lora_A.shape[0]
    hw = _hw_config()
    pdtype = jnp.dtype(compute_dtype) if compute_dtype is not None else W.dtype

    tk, in_f_p = _choose_tile_and_pad(in_f, hw["lane_tile_target"])
    tn, out_f_p = _choose_tile_and_pad(out_f, hw["lane_tile_target"])
    rank_p = _round_up(rank, 128)

    if bias is None:
        bias = jnp.zeros((out_f,), pdtype)

    # Pre-transposed + zero-padded operands (padding contributes zero).
    wt = jnp.zeros((in_f_p, out_f_p), pdtype).at[:in_f, :out_f].set(
        W.T.astype(pdtype))
    # A.T is kept unpadded along in_f (it feeds a plain jnp.dot on unpadded x),
    # padded only along rank so the kernel-side t tile is lane-aligned.
    at = jnp.zeros((in_f, rank_p), pdtype).at[:, :rank].set(
        lora_A.T.astype(pdtype))
    bt = jnp.zeros((rank_p, out_f_p), pdtype).at[:rank, :out_f].set(
        (jnp.asarray(scale, dtype=pdtype) * lora_B.astype(pdtype)).T)
    bias_p = jnp.zeros((1, out_f_p), pdtype).at[0, :out_f].set(
        bias.astype(pdtype))

    return dict(
        wt=wt, at=at, bt=bt, bias_p=bias_p,
        in_f=in_f, out_f=out_f, rank=rank,
        in_f_p=in_f_p, out_f_p=out_f_p, rank_p=rank_p,
        tk=tk, tn=tn,
        tm_target=hw["tm_target"],
        vmem_limit_bytes=hw["vmem_limit_bytes"],
        two_tc=hw["two_tc"],
        compute_dtype=pdtype,
    )


# --------------------------------------------------------------------------- #
# Per-call forward
# --------------------------------------------------------------------------- #
def linear_lora_apply(params, x):
    """LinearLora forward using prepared params.  x: (..., in_features)."""
    p = params
    in_f, out_f = p["in_f"], p["out_f"]
    in_f_p, out_f_p, rank_p = p["in_f_p"], p["out_f_p"], p["rank_p"]
    tk, tn = p["tk"], p["tn"]
    cdt = p["compute_dtype"]

    out_dtype = x.dtype
    orig_shape = x.shape
    xm = x.reshape(-1, in_f).astype(cdt)
    M = xm.shape[0]

    # Row tile: respect sublane packing for the operand dtype.
    sub = _sublane_multiple(cdt)
    tm = min(p["tm_target"], _round_up(M, sub))
    M_p = _round_up(M, tm)

    # On 2-TC parts make sure the parallel grid exposes >= 2 blocks for small M.
    if (p["two_tc"] and M_p // tm == 1 and out_f_p // tn == 1
            and tn >= 256 and (tn // 2) % 128 == 0):
        tn = tn // 2

    # LoRA down-projection: tiny (M x rank) matmul, done once per call instead
    # of once per (i, j, k) kernel step.
    t = xm @ p["at"]                                  # (M, rank_p)

    # Only pad activations when actually needed (skip the copy if aligned).
    if M_p == M and in_f_p == in_f:
        x_p = xm
    else:
        x_p = jnp.zeros((M_p, in_f_p), cdt).at[:M, :in_f].set(xm)
    if M_p == M:
        t_p = t
    else:
        t_p = jnp.zeros((M_p, rank_p), cdt).at[:M, :].set(t)

    grid = (M_p // tm, out_f_p // tn, in_f_p // tk)

    out = pl.pallas_call(
        _lora_kernel,
        out_shape=jax.ShapeDtypeStruct((M_p, out_f_p), out_dtype),
        grid_spec=pltpu.PrefetchScalarGridSpec(
            num_scalar_prefetch=0,
            grid=grid,
            in_specs=[
                pl.BlockSpec((tm, tk), lambda i, j, k: (i, k)),       # x
                pl.BlockSpec((tk, tn), lambda i, j, k: (k, j)),       # W.T
                pl.BlockSpec((tm, rank_p), lambda i, j, k: (i, 0)),   # x @ A.T
                pl.BlockSpec((rank_p, tn), lambda i, j, k: (0, j)),   # scale*B.T
                pl.BlockSpec((1, tn), lambda i, j, k: (0, j)),        # bias
            ],
            out_specs=pl.BlockSpec((tm, tn), lambda i, j, k: (i, j)),
            scratch_shapes=[
                pltpu.VMEM((tm, tn), jnp.float32),    # base-path accumulator
            ],
        ),
        compiler_params=pltpu.CompilerParams(
            # K is the reduction axis (output block constant across it);
            # M/N tiles shard across TensorCores on 2-TC parts.
            dimension_semantics=("parallel", "parallel", "arbitrary"),
            vmem_limit_bytes=p["vmem_limit_bytes"],
        ),
    )(x_p, p["wt"], t_p, p["bt"], p["bias_p"])

    return out[:M, :out_f].reshape(*orig_shape[:-1], out_f)


def linear_lora_forward(x, W, bias, lora_A, lora_B, scale=1.0):
    """Convenience one-shot API (prepares params on every call; prefer
    prepare_linear_lora_params + linear_lora_apply in real use)."""
    return linear_lora_apply(
        prepare_linear_lora_params(W, bias, lora_A, lora_B, scale), x)


# --------------------------------------------------------------------------- #
# Demo / self-test
# --------------------------------------------------------------------------- #
def _init_params(key, in_features, out_features, rank, dtype=jnp.float32):
    """Deterministic synthetic parameter init (mirrors the module's shapes)."""
    k_w, k_b, k_a, k_bb = jax.random.split(key, 4)

    # nn.Linear default: U(-1/sqrt(fan_in), 1/sqrt(fan_in)) for weight & bias.
    lim = 1.0 / math.sqrt(in_features)
    W = jax.random.uniform(k_w, (out_features, in_features), dtype, -lim, lim)
    b = jax.random.uniform(k_b, (out_features,), dtype, -lim, lim)

    # kaiming_uniform_(a=sqrt(5)) on lora_A -> bound = 1/sqrt(fan_in).
    bound_a = 1.0 / math.sqrt(in_features)
    lora_A = jax.random.uniform(k_a, (rank, in_features), dtype,
                                -bound_a, bound_a)

    # Module inits lora_B to zeros; use small random values here so the LoRA
    # path actually exercises the kernel (as it would after training).
    lora_B = 0.05 * jax.random.normal(k_bb, (out_features, rank), dtype)

    return W, b, lora_A, lora_B


if __name__ == "__main__":
    key = jax.random.PRNGKey(0)
    k_x, k_p = jax.random.split(key)

    batch, seq = 2, 8
    in_features, out_features, rank = 32, 48, 16
    scale = 1.25

    x = jax.random.normal(k_x, (batch, seq, in_features), jnp.float32)
    W, b, lora_A, lora_B = _init_params(k_p, in_features, out_features, rank)

    # Parameters are preprocessed ONCE (transpose / pad / scale fold) ...
    params = prepare_linear_lora_params(W, b, lora_A, lora_B, scale=scale)
    # ... then the per-call path only touches activations.
    y = linear_lora_apply(params, x)
    y = jax.block_until_ready(y)

    # Pure-JAX reference for correctness.
    y_ref = x @ W.T + b + scale * ((x @ lora_A.T) @ lora_B.T)
    assert y.shape == (batch, seq, out_features)
    assert jnp.allclose(y, y_ref, atol=1e-5, rtol=1e-5), "mismatch vs reference"

    print("KERNEL_OK")
</pallas_src>

<mosaic_0001>
module attributes {stable_mosaic.version = 11 : i64} {
  func.func @_lora_kernel(%arg0: i32, %arg1: i32, %arg2: i32, %arg3: memref<16x128xf32, #tpu.memory_space<vmem>>, %arg4: memref<128x128xf32, #tpu.memory_space<vmem>>, %arg5: memref<16x128xf32, #tpu.memory_space<vmem>>, %arg6: memref<128x128xf32, #tpu.memory_space<vmem>>, %arg7: memref<1x128xf32, #tpu.memory_space<vmem>>, %arg8: memref<16x128xf32, #tpu.memory_space<vmem>>, %arg9: memref<16x128xf32, #tpu.memory_space<vmem>>) attributes {dimension_semantics = [#tpu.dimension_semantics<parallel>, #tpu.dimension_semantics<parallel>, #tpu.dimension_semantics<arbitrary>], iteration_bounds = array<i64: 1, 1, 1>, scalar_prefetch = 0 : i64, scratch_operands = 1 : i64, tpu.core_type = #tpu.core_type<tc>, window_params = [{transform_indices = @transform_0, window_bounds = array<i64: 16, 128>}, {transform_indices = @transform_1, window_bounds = array<i64: 128, 128>}, {transform_indices = @transform_2, window_bounds = array<i64: 16, 128>}, {transform_indices = @transform_3, window_bounds = array<i64: 128, 128>}, {transform_indices = @transform_4, window_bounds = array<i64: 1, 128>}, {transform_indices = @transform_5, window_bounds = array<i64: 16, 128>}]} {
    %c0_i32 = arith.constant 0 : i32
    %0 = arith.cmpi eq, %arg2, %c0_i32 : i32
    %1 = arith.extui %0 : i1 to i32
    %c0_i32_0 = arith.constant 0 : i32
    %2 = arith.cmpi ne, %1, %c0_i32_0 : i32
    scf.if %2 {
      %cst_10 = arith.constant 0.000000e+00 : f32
      %12 = vector.broadcast %cst_10 : f32 to vector<16x128xf32>
      %c0_11 = arith.constant 0 : index
      %c0_12 = arith.constant 0 : index
      %13 = vector.load %arg9[%c0_11, %c0_12] : memref<16x128xf32, #tpu.memory_space<vmem>>, vector<16x128xf32>
      tpu.vector_store %arg9[%c0_11, %c0_12], %12 {strides = array<i32>} : memref<16x128xf32, #tpu.memory_space<vmem>>, vector<16x128xf32>,
    } else {
    }
    %c0 = arith.constant 0 : index
    %c0_1 = arith.constant 0 : index
    %3 = vector.load %arg9[%c0, %c0_1] : memref<16x128xf32, #tpu.memory_space<vmem>>, vector<16x128xf32>
    %c0_2 = arith.constant 0 : index
    %c0_3 = arith.constant 0 : index
    %4 = vector.load %arg3[%c0_2, %c0_3] : memref<16x128xf32, #tpu.memory_space<vmem>>, vector<16x128xf32>
    %c0_4 = arith.constant 0 : index
    %c0_5 = arith.constant 0 : index
    %5 = vector.load %arg4[%c0_4, %c0_5] : memref<128x128xf32, #tpu.memory_space<vmem>>, vector<128x128xf32>
    %cst = arith.constant dense<0.000000e+00> : vector<16x128xf32>
    %6 = tpu.matmul %4, %5, %cst {dimension_numbers = #tpu.dot_dimension_numbers<[1], [0], [0], [1], [0, 0, 1, 1], [], []>} : vector<16x128xf32>, vector<128x128xf32>, vector<16x128xf32> -> vector<16x128xf32>
    %7 = arith.addf %3, %6 : vector<16x128xf32>
    %c0_6 = arith.constant 0 : index
    %c0_7 = arith.constant 0 : index
    %8 = vector.load %arg9[%c0_6, %c0_7] : memref<16x128xf32, #tpu.memory_space<vmem>>, vector<16x128xf32>
    tpu.vector_store %arg9[%c0_6, %c0_7], %7 {strides = array<i32>} : memref<16x128xf32, #tpu.memory_space<vmem>>, vector<16x128xf32>,
    %c0_i32_8 = arith.constant 0 : i32
    %9 = arith.cmpi eq, %arg2, %c0_i32_8 : i32
    %10 = arith.extui %9 : i1 to i32
    %c0_i32_9 = arith.constant 0 : i32
    %11 = arith.cmpi ne, %10, %c0_i32_9 : i32
    scf.if %11 {
      %c0_10 = arith.constant 0 : index
      %c0_11 = arith.constant 0 : index
      %12 = vector.load %arg5[%c0_10, %c0_11] : memref<16x128xf32, #tpu.memory_space<vmem>>, vector<16x128xf32>
      %c0_12 = arith.constant 0 : index
      %c0_13 = arith.constant 0 : index
      %13 = vector.load %arg6[%c0_12, %c0_13] : memref<128x128xf32, #tpu.memory_space<vmem>>, vector<128x128xf32>
      %cst_14 = arith.constant dense<0.000000e+00> : vector<16x128xf32>
      %14 = tpu.matmul %12, %13, %cst_14 {dimension_numbers = #tpu.dot_dimension_numbers<[1], [0], [0], [1], [0, 0, 1, 1], [], []>} : vector<16x128xf32>, vector<128x128xf32>, vector<16x128xf32> -> vector<16x128xf32>
      %c0_15 = arith.constant 0 : index
      %c0_16 = arith.constant 0 : index
      %15 = vector.load %arg9[%c0_15, %c0_16] : memref<16x128xf32, #tpu.memory_space<vmem>>, vector<16x128xf32>
      %c0_17 = arith.constant 0 : index
      %c0_18 = arith.constant 0 : index
      %16 = vector.load %arg7[%c0_17, %c0_18] : memref<1x128xf32, #tpu.memory_space<vmem>>, vector<1x128xf32>
      %17 = vector.broadcast %16 : vector<1x128xf32> to vector<16x128xf32>
      %18 = arith.addf %15, %17 : vector<16x128xf32>
      %19 = arith.addf %18, %14 : vector<16x128xf32>
      %c0_19 = arith.constant 0 : index
      %c0_20 = arith.constant 0 : index
      %20 = vector.load %arg8[%c0_19, %c0_20] : memref<16x128xf32, #tpu.memory_space<vmem>>, vector<16x128xf32>
      tpu.vector_store %arg8[%c0_19, %c0_20], %19 {strides = array<i32>} : memref<16x128xf32, #tpu.memory_space<vmem>>, vector<16x128xf32>,
    } else {
    }
    return
  }
  func.func @transform_0(%arg0: i32, %arg1: i32, %arg2: i32) -> (i32, i32) {
    %c0_i32 = arith.constant 0 : i32
    return %arg0, %arg2 : i32, i32
  }
  func.func @transform_1(%arg0: i32, %arg1: i32, %arg2: i32) -> (i32, i32) {
    %c0_i32 = arith.constant 0 : i32
    return %arg2, %arg1 : i32, i32
  }
  func.func @transform_2(%arg0: i32, %arg1: i32, %arg2: i32) -> (i32, i32) {
    %c0_i32 = arith.constant 0 : i32
    %c0_i32_0 = arith.constant 0 : i32
    return %arg0, %c0_i32 : i32, i32
  }
  func.func @transform_3(%arg0: i32, %arg1: i32, %arg2: i32) -> (i32, i32) {
    %c0_i32 = arith.constant 0 : i32
    %c0_i32_0 = arith.constant 0 : i32
    return %c0_i32, %arg1 : i32, i32
  }
  func.func @transform_4(%arg0: i32, %arg1: i32, %arg2: i32) -> (i32, i32) {
    %c0_i32 = arith.constant 0 : i32
    %c0_i32_0 = arith.constant 0 : i32
    return %c0_i32, %arg1 : i32, i32
  }
  func.func @transform_5(%arg0: i32, %arg1: i32, %arg2: i32) -> (i32, i32) {
    %c0_i32 = arith.constant 0 : i32
    return %arg0, %arg1 : i32, i32
  }
}

</mosaic_0001>

<bundles_post_ra>
// kernel: tpu_custom_call.1
= control target key start
LH: loop header
LB: loop body
LE: loop exit
PB: predicated region body
PF: predicated region fallthrough
CT: control target
= control target key end

     0   :  { %10 = vsyncpa [#allocation4], 0  ;;  %s452_s0 = inlined_call_operand.hbm [shape: f32[16,128], index: 0, kind: input, shape index: {}]   ;;  %s453_s1 = inlined_call_operand.hbm [shape: f32[128,128], index: 1, kind: input, shape index: {}]   ;;  %s454_s2 = inlined_call_operand.hbm [shape: f32[16,128], index: 2, kind: input, shape index: {}]   ;;  %s455_s3 = inlined_call_operand.hbm [shape: f32[128,128], index: 3, kind: input, shape index: {}]   ;;  %s456_s4 = inlined_call_operand.vmem [shape: f32[1,128], index: 4, kind: input, shape index: {}]   ;;  %s457_s5 = inlined_call_operand.hbm [shape: f32[16,128], index: 5, kind: output, shape index: {}]  }
   0x1   :  { %11 = vsyncpa [#allocation7], 0 }
   0x2   :  { %12 = vsyncpa [#allocation10], 0 }
   0x3   :  { %13 = vsyncpa [#allocation5], 0  ;;  %s31_s20 = sshll.u32 %s453_s1, 4  ;;  %s382_s21 = smov [#allocation6]   ;;  %s32_s20 = int_to_ptr.hbm [resolvable:$true] %s31_s20 }
   0x4   :  { %s33_s22 = sshll.u32 %s382_s21, 4  ;;  %s18_s25 = sshll.u32 %s452_s0, 4  ;;  %s34_s22 = int_to_ptr.vmem [resolvable:$true] %s33_s22  ;;  %s19_s25 = int_to_ptr.hbm [resolvable:$true] %s18_s25 }
   0x5   :  { %s383_s26 = smov 128   ;;  %s384_s27 = smov 8  }
   0x6   :  { %39 = dma.hbm_to_vmem [thread:$0]  %s32_s20, 2048, %s34_s22, [#allocation7], %s383_s26, %s383_s26, %s384_s27  }
   0x7   :  { %s385_s28 = smov [#allocation3]   ;;  %s44_s1 = sshll.u32 %s454_s2, 4  ;;  %s45_s1 = int_to_ptr.hbm [resolvable:$true] %s44_s1 }
   0x8   :  { %s20_s29 = sshll.u32 %s385_s28, 4  ;;  %s57_s8 = sshll.u32 %s455_s3, 4  ;;  %s21_s29 = int_to_ptr.vmem [resolvable:$true] %s20_s29  ;;  %s58_s8 = int_to_ptr.hbm [resolvable:$true] %s57_s8 }
   0x9   :  { %26 = dma.hbm_to_vmem [thread:$0]  %s19_s25, 256, %s21_s29, [#allocation4], %s383_s26, %s383_s26, %s384_s27  }
   0xa   :  { %s386_s9 = smov [#allocation8]   ;;  %s387_s11 = smov [#allocation9]  }
   0xb   :  { %s46_s10 = sshll.u32 %s386_s9, 4  ;;  %s59_s2 = sshll.u32 %s387_s11, 4  ;;  %s47_s10 = int_to_ptr.vmem [resolvable:$true] %s46_s10  ;;  %s60_s2 = int_to_ptr.vmem [resolvable:$true] %s59_s2 }
   0xc   :  { %52 = dma.hbm_to_vmem [thread:$0]  %s45_s1, 256, %s47_s10, [#allocation7], %s383_s26, %s383_s26, %s384_s27  }
   0xd   :  { %65 = dma.hbm_to_vmem [thread:$0]  %s58_s8, 2048, %s60_s2, [#allocation10], %s383_s26, %s383_s26, %s384_s27  }
   0xe   :  { %374 = dma.done.wait [#allocation4], 256  }
   0xf   :  { %375 = vsyncadd [#allocation4], 4294967040 }
  0x10   :  { %376 = dma.done.wait [#allocation7], 2304  }
  0x11   :  { %377 = vsyncadd [#allocation7], 4294964992 }
  0x12   :  { %378 = dma.done.wait [#allocation10], 2048  }
  0x13   :  { %379 = vsyncadd [#allocation10], 4294965248  ;;  %v109_v0 = vld [vmem:[#allocation6 + $0x78] sm:$0xff]  ;;  %v108_v1 = vld [vmem:[#allocation6 + $0x70] sm:$0xff]  ;;  %s388_s13 = smov [#allocation11]   ;;  %s199_s17 = sshll.u32 %s457_s5, 4  ;;  %s200_s17 = int_to_ptr.hbm [resolvable:$true] %s199_s17 }
  0x14   :  { %v157_v2 = vld [vmem:[#allocation9 + $0x78] sm:$0xff]  ;;  %214 = vmatpush.msra.mxu2 %v109_v0  ;;  %v156_v3 = vld [vmem:[#allocation9 + $0x70] sm:$0xff]  ;;  %110 = vmatpush.msra.mxu0 %v109_v0  ;;  %v155_v5 = vld [vmem:[#allocation9 + $0x68] sm:$0xff]  ;;  %s197_s14 = sshll.u32 %s388_s13, 4  ;;  %s198_s14 = int_to_ptr.vmem [resolvable:$true] %s197_s14 }
  0x15   :  { %230 = vmatpush.msra.mxu3 %v157_v2  ;;  %v107_v4 = vld [vmem:[#allocation6 + $0x68] sm:$0xff]  ;;  %158 = vmatpush.msra.mxu1 %v157_v2  ;;  %v106_v6 = vld [vmem:[#allocation6 + $0x60] sm:$0xff]  ;;  %v154_v7 = vld [vmem:[#allocation9 + $0x60] sm:$0xff] }
  0x16   :  { %215 = vmatpush.msra.mxu2 %v108_v1  ;;  %111 = vmatpush.msra.mxu0 %v108_v1  ;;  %v105_v8 = vld [vmem:[#allocation6 + $0x58] sm:$0xff]  ;;  %v153_v9 = vld [vmem:[#allocation9 + $0x58] sm:$0xff]  ;;  %v104_v10 = vld [vmem:[#allocation6 + $0x50] sm:$0xff] }
  0x17   :  { %231 = vmatpush.msra.mxu3 %v156_v3  ;;  %159 = vmatpush.msra.mxu1 %v156_v3  ;;  %v152_v11 = vld [vmem:[#allocation9 + $0x50] sm:$0xff]  ;;  %v103_v12 = vld [vmem:[#allocation6 + $0x48] sm:$0xff]  ;;  %v151_v13 = vld [vmem:[#allocation9 + $0x48] sm:$0xff] }
  0x18   :  { %216 = vmatpush.msra.mxu2 %v107_v4  ;;  %112 = vmatpush.msra.mxu0 %v107_v4  ;;  %v102_v14 = vld [vmem:[#allocation6 + $0x40] sm:$0xff]  ;;  %v150_v15 = vld [vmem:[#allocation9 + $0x40] sm:$0xff]  ;;  %v101_v16 = vld [vmem:[#allocation6 + $0x38] sm:$0xff] }
  0x19   :  { %232 = vmatpush.msra.mxu3 %v155_v5  ;;  %160 = vmatpush.msra.mxu1 %v155_v5  ;;  %v149_v17 = vld [vmem:[#allocation9 + $0x38] sm:$0xff]  ;;  %v100_v18 = vld [vmem:[#allocation6 + $0x30] sm:$0xff]  ;;  %v148_v19 = vld [vmem:[#allocation9 + $0x30] sm:$0xff] }
  0x1a   :  { %217 = vmatpush.msra.mxu2 %v106_v6  ;;  %113 = vmatpush.msra.mxu0 %v106_v6  ;;  %v99_v20 = vld [vmem:[#allocation6 + $0x28] sm:$0xff]  ;;  %v147_v21 = vld [vmem:[#allocation9 + $0x28] sm:$0xff]  ;;  %v98_v22 = vld [vmem:[#allocation6 + $0x20] sm:$0xff] }
  0x1b   :  { %233 = vmatpush.msra.mxu3 %v154_v7  ;;  %161 = vmatpush.msra.mxu1 %v154_v7  ;;  %v146_v23 = vld [vmem:[#allocation9 + $0x20] sm:$0xff]  ;;  %v97_v24 = vld [vmem:[#allocation6 + $0x18] sm:$0xff]  ;;  %v145_v25 = vld [vmem:[#allocation9 + $0x18] sm:$0xff] }
  0x1c   :  { %218 = vmatpush.msra.mxu2 %v105_v8  ;;  %114 = vmatpush.msra.mxu0 %v105_v8  ;;  %v96_v26 = vld [vmem:[#allocation6 + $0x10] sm:$0xff]  ;;  %v144_v27 = vld [vmem:[#allocation9 + $0x10] sm:$0xff]  ;;  %v95_v28 = vld [vmem:[#allocation6 + $0x8] sm:$0xff] }
  0x1d   :  { %234 = vmatpush.msra.mxu3 %v153_v9  ;;  %162 = vmatpush.msra.mxu1 %v153_v9  ;;  %v143_v29 = vld [vmem:[#allocation9 + $0x8] sm:$0xff]  ;;  %v94_v30 = vld [vmem:[#allocation6] sm:$0xff]  ;;  %v142_v31 = vld [vmem:[#allocation9] sm:$0xff] }
  0x1e   :  { %219 = vmatpush.msra.mxu2 %v104_v10  ;;  %115 = vmatpush.msra.mxu0 %v104_v10  ;;  %v93_v32 = vld [vmem:[#allocation3 + $0x8] sm:$0xff]  ;;  %v141_v33 = vld [vmem:[#allocation8 + $0x8] sm:$0xff]  ;;  %v92_v34 = vld [vmem:[#allocation3] sm:$0xff] }
  0x1f   :  { %235 = vmatpush.msra.mxu3 %v152_v11  ;;  %163 = vmatpush.msra.mxu1 %v152_v11  ;;  %v140_v35 = vld [vmem:[#allocation8] sm:$0xff]  ;;  %v253_v36 = vld [vmem:[%s456_s4] ss:$0 sm:$0xff] }
  0x20   :  { %220 = vmatpush.msra.mxu2 %v103_v12  ;;  %116 = vmatpush.msra.mxu0 %v103_v12 }
  0x21   :  { %236 = vmatpush.msra.mxu3 %v151_v13  ;;  %164 = vmatpush.msra.mxu1 %v151_v13 }
  0x22   :  { %221 = vmatpush.msra.mxu2 %v102_v14  ;;  %117 = vmatpush.msra.mxu0 %v102_v14 }
  0x23   :  { %237 = vmatpush.msra.mxu3 %v150_v15  ;;  %165 = vmatpush.msra.mxu1 %v150_v15 }
  0x24   :  { %222 = vmatpush.msra.mxu2 %v101_v16  ;;  %118 = vmatpush.msra.mxu0 %v101_v16 }
  0x25   :  { %238 = vmatpush.msra.mxu3 %v149_v17  ;;  %166 = vmatpush.msra.mxu1 %v149_v17 }
  0x26   :  { %223 = vmatpush.msra.mxu2 %v100_v18  ;;  %119 = vmatpush.msra.mxu0 %v100_v18 }
  0x27   :  { %239 = vmatpush.msra.mxu3 %v148_v19  ;;  %167 = vmatpush.msra.mxu1 %v148_v19 }
  0x28   :  { %224 = vmatpush.msra.mxu2 %v99_v20  ;;  %120 = vmatpush.msra.mxu0 %v99_v20 }
  0x29   :  { %240 = vmatpush.msra.mxu3 %v147_v21  ;;  %168 = vmatpush.msra.mxu1 %v147_v21 }
  0x2a   :  { %225 = vmatpush.msra.mxu2 %v98_v22  ;;  %121 = vmatpush.msra.mxu0 %v98_v22 }
  0x2b   :  { %241 = vmatpush.msra.mxu3 %v146_v23  ;;  %169 = vmatpush.msra.mxu1 %v146_v23 }
  0x2c   :  { %226 = vmatpush.msra.mxu2 %v97_v24  ;;  %122 = vmatpush.msra.mxu0 %v97_v24 }
  0x2d   :  { %242 = vmatpush.msra.mxu3 %v145_v25  ;;  %170 = vmatpush.msra.mxu1 %v145_v25 }
  0x2e   :  { %227 = vmatpush.msra.mxu2 %v96_v26  ;;  %123 = vmatpush.msra.mxu0 %v96_v26 }
  0x2f   :  { %243 = vmatpush.msra.mxu3 %v144_v27  ;;  %171 = vmatpush.msra.mxu1 %v144_v27 }
  0x30   :  { %228 = vmatpush.msra.mxu2 %v95_v28  ;;  %124 = vmatpush.msra.mxu0 %v95_v28 }
  0x31   :  { %244 = vmatpush.msra.mxu3 %v143_v29  ;;  %172 = vmatpush.msra.mxu1 %v143_v29 }
  0x32   :  { %229 = vmatpush.msra.mxu2 %v94_v30  ;;  %125 = vmatpush.msra.mxu0 %v94_v30 }
  0x33   :  { %245 = vmatpush.msra.mxu3 %v142_v31  ;;  %129 = vmatmul.f32.vlgmr.msra.gmra.mxu2 %v93_v32 }
  0x34   :  { %177 = vmatmul.f32.vlgmr.msra.gmra.mxu3 %v141_v33  ;;  %173 = vmatpush.msra.mxu1 %v142_v31 }
  0x35   :  { %126 = vmatmul.f32.vlgmr.msra.gmra.mxu0 %v92_v34  ;;  %174 = vmatmul.f32.vlgmr.msra.gmra.mxu1 %v140_v35 }
  0xb2   :  { %v127_v37 = vpop.f32.mrf.mxu0  ;;  %v175_v38 = vpop.f32.mrf.mxu1 }
  0xb3   :  { %v187_v39 = vadd.f32 %v253_v36, %v127_v37 }
  0xb5   :  { %v189_v40 = vadd.f32 %v187_v39, %v175_v38 }
  0xb6   :  { %v130_v41 = vpop.f32.mrf.mxu2 }
  0xb7   :  { %v178_v42 = vpop.f32.mrf.mxu3  ;;  %v188_v43 = vadd.f32 %v253_v36, %v130_v41  ;;  %191 = vst [vmem:[#allocation11] sm:$0xff] %v189_v40 }
  0xb9   :  { %v190_v44 = vadd.f32 %v188_v43, %v178_v42 }
  0xbb   :  { %192 = vst [vmem:[#allocation11 + $0x8] sm:$0xff] %v190_v44 }
  0xbc   :  { %205 = dma.vmem_to_hbm [thread:$0]  %s198_s14, 256, %s200_s17, [#allocation5], %s383_s26, %s383_s26, %s384_s27  }
  0xbd   :  { %380 = dma.done.wait [#allocation5], 256  }
  0xbe   :  { %381 = vsyncadd [#allocation5], 4294967040 }
  0xbf   :  { %210 = vsyncpa [#allocation4], 1 }
  0xc0   :  { %211 = vsyncpa [#allocation7], 1 }
  0xc1   :  { %212 = vsyncpa [#allocation10], 1 }
  0xc2   :  { %213 = vsyncpa [#allocation5], 1 }

</bundles_post_ra>
